<compile_context>
chip_gen: v5e
topology: v5e:2x2
jax: 0.10.0
libtpu: 0.0.40
codegen_flags: <defaults>
</compile_context>

<pallas_src>
import jax
import jax.numpy as jnp
from jax.experimental import pallas as pl
from jax.experimental.pallas import tpu as pltpu

EPSILON = float(jnp.finfo(jnp.float32).eps)  # == torch.finfo(torch.float32).eps

_LANE = 128     # lane width (last dim)
_SUBLANE = 8    # f32 sublane count (second-to-last dim)


def _round_up(v: int, m: int) -> int:
    return (v + m - 1) // m * m


def prepare_weights(w1, w2, matmul_dtype=jnp.float32):
    """One-time weight prep: transpose PyTorch (out, in) weights to (in, out) and
    zero-pad comp/features up to lane multiples.  Cache the result across forward
    calls (e.g. over the NMF unrolled-layer loop); do NOT redo this per step.
    For MXU-bound sizes on v6e/v7x pass matmul_dtype=jnp.bfloat16."""
    C, C2 = w1.shape
    assert C == C2, "fc1 must be (comp, comp)"
    C_w2, F = w2.shape
    assert C_w2 == C, "fc2 must be (comp, features)"
    Cp = _round_up(C, _LANE)
    Fp = _round_up(F, _LANE)
    w1t = jnp.zeros((Cp, Cp), matmul_dtype).at[:C, :C].set(w1.T.astype(matmul_dtype))
    w2t = jnp.zeros((Fp, Cp), matmul_dtype).at[:F, :C].set(w2.T.astype(matmul_dtype))
    return w1t, w2t


def _make_kernel(l1: float, l2: float, matmul_dtype):
    """Kernel body with L1/L2 baked in as compile-time scalars."""

    def kernel(y_ref, x_ref, w1t_ref, w2t_ref, o_ref):
        y = y_ref[...]                                            # (TB, Cp) f32
        # numerator = fc2(x) = x @ W2^T                           (MXU)
        num = jnp.dot(x_ref[...].astype(matmul_dtype), w2t_ref[...],
                      preferred_element_type=jnp.float32)
        # denominator = fc1(y) + l2*y + l1 + EPS                  (MXU + VPU, f32)
        den = jnp.dot(y.astype(matmul_dtype), w1t_ref[...],
                      preferred_element_type=jnp.float32)
        den = den + l2 * y + (l1 + EPSILON)
        inv_den = pl.reciprocal(den, approx=False)                # EUP slot
        o_ref[...] = (num * inv_den * y).astype(o_ref.dtype)

    return kernel


def _pick_block_b(b_pad: int, c_pad: int, f_pad: int, weight_itemsize: int,
                  budget_bytes: int = 40 << 20) -> int:
    """Largest multiple of 8 (capped at 512) whose double-buffered activation tiles
    plus (double-buffered) resident weights fit the VMEM budget (safe on v7x)."""
    weight_bytes = 2 * (c_pad * c_pad + f_pad * c_pad) * weight_itemsize
    tb = min(512, b_pad)
    while tb > _SUBLANE:
        act_bytes = 2 * tb * (2 * c_pad + f_pad) * 4   # y + out (Cp) + x (Fp), f32, x2 bufs
        if weight_bytes + act_bytes <= budget_bytes:
            break
        tb -= _SUBLANE
    return max(tb, _SUBLANE)


def super_layer(y, x, w1t_pad, w2t_pad, l1: float, l2: float, block_b: int | None = None):
    """
    y:        (B, comp)            float32
    x:        (B, features)        float32
    w1t_pad:  (Cp, Cp)  padded fc1.weight^T from prepare_weights()
    w2t_pad:  (Fp, Cp)  padded fc2.weight^T from prepare_weights()
    """
    B, C = y.shape
    Bx, F = x.shape
    assert Bx == B
    Cp = w1t_pad.shape[1]
    Fp = w2t_pad.shape[0]
    matmul_dtype = w1t_pad.dtype
    wsize = jnp.dtype(matmul_dtype).itemsize

    if block_b is None:
        block_b = _pick_block_b(_round_up(B, _SUBLANE), Cp, Fp, wsize)
    Bp = _round_up(max(B, block_b), block_b)

    # Zero-pad activations to lane-dense, tile-divisible shapes (padded lanes/rows
    # produce zeros in the output and are sliced away below).
    y_pad = jnp.zeros((Bp, Cp), jnp.float32).at[:B, :C].set(y.astype(jnp.float32))
    x_pad = jnp.zeros((Bp, Fp), jnp.float32).at[:B, :F].set(x.astype(jnp.float32))

    grid = (Bp // block_b,)

    weight_bytes = 2 * (Cp * Cp + Fp * Cp) * wsize
    act_bytes = 2 * block_b * (2 * Cp + Fp) * 4
    vmem_limit = int(min(max(weight_bytes + act_bytes + (4 << 20), 16 << 20), 96 << 20))

    cost = pl.CostEstimate(
        flops=2 * Bp * Cp * (Cp + Fp) + 4 * Bp * Cp,
        transcendentals=0,
        bytes_accessed=4 * (Bp * Fp + 3 * Bp * Cp) + wsize * (Cp * Cp + Fp * Cp),
    )

    kernel = _make_kernel(float(l1), float(l2), matmul_dtype)

    out_pad = pl.pallas_call(
        kernel,
        out_shape=jax.ShapeDtypeStruct((Bp, Cp), jnp.float32),
        grid=grid,
        in_specs=[
            pl.BlockSpec((block_b, Cp), lambda i: (i, 0)),   # y tile (pipelined)
            pl.BlockSpec((block_b, Fp), lambda i: (i, 0)),   # x tile (pipelined)
            pl.BlockSpec((Cp, Cp), lambda i: (0, 0)),        # W1^T resident
            pl.BlockSpec((Fp, Cp), lambda i: (0, 0)),        # W2^T resident
        ],
        out_specs=pl.BlockSpec((block_b, Cp), lambda i: (i, 0)),
        compiler_params=pltpu.CompilerParams(
            dimension_semantics=("parallel",),               # megacore split on v7x
            vmem_limit_bytes=vmem_limit,
        ),
        cost_estimate=cost,
    )(y_pad, x_pad, w1t_pad, w2t_pad)

    return out_pad[:B, :C]

    # TODO(synk): for features >~8K add a K-reduction grid axis over F with a VMEM
    # accumulator (P3 pattern) instead of keeping the full W2^T slab resident.


if __name__ == "__main__":
    # Small deterministic sizes consistent with SuperLayer(comp, features, L1, L2).
    B = 8          # batch
    COMP = 32      # comp
    FEATURES = 64  # features
    L1 = 0.01
    L2 = 0.1

    key = jax.random.PRNGKey(0)
    k_y, k_x, k_w1, k_w2 = jax.random.split(key, 4)

    # Positive activations (typical for multiplicative NMF updates).
    y = jax.random.uniform(k_y, (B, COMP), dtype=jnp.float32) + 0.1
    x = jax.random.uniform(k_x, (B, FEATURES), dtype=jnp.float32) + 0.1
    # PyTorch-layout (out, in) weights, positive.
    w1 = jax.random.uniform(k_w1, (COMP, COMP), dtype=jnp.float32) * 0.1 + 0.01
    w2 = jax.random.uniform(k_w2, (COMP, FEATURES), dtype=jnp.float32) * 0.1 + 0.01

    # One-time weight prep (hoisted out of the per-step path; cache across NMF loop).
    # For large MXU-bound problems on v6e/v7x use matmul_dtype=jnp.bfloat16 here.
    w1t_pad, w2t_pad = prepare_weights(w1, w2, matmul_dtype=jnp.float32)

    out = super_layer(y, x, w1t_pad, w2t_pad, L1, L2)
    out = jax.block_until_ready(out)

    # Pure-JAX reference (matches the PyTorch forward).
    den_ref = y @ w1.T + L2 * y + L1 + EPSILON
    num_ref = x @ w2.T
    ref = (num_ref / den_ref) * y
    assert out.shape == (B, COMP)
    assert jnp.allclose(out, ref, rtol=1e-5, atol=1e-5), "mismatch vs reference"

    print("KERNEL_OK")
</pallas_src>

<mosaic_0001>
module attributes {stable_mosaic.version = 11 : i64} {
  func.func @kernel(%arg0: i32, %arg1: memref<8x128xf32, #tpu.memory_space<vmem>>, %arg2: memref<8x128xf32, #tpu.memory_space<vmem>>, %arg3: memref<128x128xf32, #tpu.memory_space<vmem>>, %arg4: memref<128x128xf32, #tpu.memory_space<vmem>>, %arg5: memref<8x128xf32, #tpu.memory_space<vmem>>) attributes {dimension_semantics = [#tpu.dimension_semantics<parallel>], iteration_bounds = array<i64: 1>, scalar_prefetch = 0 : i64, scratch_operands = 0 : i64, tpu.core_type = #tpu.core_type<tc>, window_params = [{transform_indices = @transform_0, window_bounds = array<i64: 8, 128>}, {transform_indices = @transform_1, window_bounds = array<i64: 8, 128>}, {pipeline_mode = #tpu.pipeline_mode<synchronous>, transform_indices = @transform_2, window_bounds = array<i64: 128, 128>}, {pipeline_mode = #tpu.pipeline_mode<synchronous>, transform_indices = @transform_3, window_bounds = array<i64: 128, 128>}, {transform_indices = @transform_4, window_bounds = array<i64: 8, 128>}]} {
    %c0 = arith.constant 0 : index
    %c0_0 = arith.constant 0 : index
    %0 = vector.load %arg1[%c0, %c0_0] : memref<8x128xf32, #tpu.memory_space<vmem>>, vector<8x128xf32>
    %c0_1 = arith.constant 0 : index
    %c0_2 = arith.constant 0 : index
    %1 = vector.load %arg2[%c0_1, %c0_2] : memref<8x128xf32, #tpu.memory_space<vmem>>, vector<8x128xf32>
    %c0_3 = arith.constant 0 : index
    %c0_4 = arith.constant 0 : index
    %2 = vector.load %arg4[%c0_3, %c0_4] : memref<128x128xf32, #tpu.memory_space<vmem>>, vector<128x128xf32>
    %cst = arith.constant dense<0.000000e+00> : vector<8x128xf32>
    %3 = tpu.matmul %1, %2, %cst {dimension_numbers = #tpu.dot_dimension_numbers<[1], [0], [0], [1], [0, 0, 1, 1], [], []>} : vector<8x128xf32>, vector<128x128xf32>, vector<8x128xf32> -> vector<8x128xf32>
    %c0_5 = arith.constant 0 : index
    %c0_6 = arith.constant 0 : index
    %4 = vector.load %arg3[%c0_5, %c0_6] : memref<128x128xf32, #tpu.memory_space<vmem>>, vector<128x128xf32>
    %cst_7 = arith.constant dense<0.000000e+00> : vector<8x128xf32>
    %5 = tpu.matmul %0, %4, %cst_7 {dimension_numbers = #tpu.dot_dimension_numbers<[1], [0], [0], [1], [0, 0, 1, 1], [], []>} : vector<8x128xf32>, vector<128x128xf32>, vector<8x128xf32> -> vector<8x128xf32>
    %cst_8 = arith.constant 1.000000e-01 : f32
    %6 = vector.broadcast %cst_8 : f32 to vector<8x128xf32>
    %7 = arith.mulf %6, %0 : vector<8x128xf32>
    %8 = arith.addf %5, %7 : vector<8x128xf32>
    %cst_9 = arith.constant 0.010000119 : f32
    %9 = vector.broadcast %cst_9 : f32 to vector<8x128xf32>
    %10 = arith.addf %8, %9 : vector<8x128xf32>
    %11 = tpu.reciprocal %10 : vector<8x128xf32> -> vector<8x128xf32>
    %12 = arith.mulf %3, %11 : vector<8x128xf32>
    %13 = arith.mulf %12, %0 : vector<8x128xf32>
    %c0_10 = arith.constant 0 : index
    %c0_11 = arith.constant 0 : index
    %14 = vector.load %arg5[%c0_10, %c0_11] : memref<8x128xf32, #tpu.memory_space<vmem>>, vector<8x128xf32>
    tpu.vector_store %arg5[%c0_10, %c0_11], %13 {strides = array<i32>} : memref<8x128xf32, #tpu.memory_space<vmem>>, vector<8x128xf32>,
    return
  }
  func.func @transform_0(%arg0: i32) -> (i32, i32) {
    %c0_i32 = arith.constant 0 : i32
    %c0_i32_0 = arith.constant 0 : i32
    return %arg0, %c0_i32 : i32, i32
  }
  func.func @transform_1(%arg0: i32) -> (i32, i32) {
    %c0_i32 = arith.constant 0 : i32
    %c0_i32_0 = arith.constant 0 : i32
    return %arg0, %c0_i32 : i32, i32
  }
  func.func @transform_2(%arg0: i32) -> (i32, i32) {
    %c0_i32 = arith.constant 0 : i32
    %c0_i32_0 = arith.constant 0 : i32
    %c0_i32_1 = arith.constant 0 : i32
    return %c0_i32, %c0_i32_0 : i32, i32
  }
  func.func @transform_3(%arg0: i32) -> (i32, i32) {
    %c0_i32 = arith.constant 0 : i32
    %c0_i32_0 = arith.constant 0 : i32
    %c0_i32_1 = arith.constant 0 : i32
    return %c0_i32, %c0_i32_0 : i32, i32
  }
  func.func @transform_4(%arg0: i32) -> (i32, i32) {
    %c0_i32 = arith.constant 0 : i32
    %c0_i32_0 = arith.constant 0 : i32
    return %arg0, %c0_i32 : i32, i32
  }
}

</mosaic_0001>

<bundles_post_ra>
// kernel: tpu_custom_call.1
= control target key start
LH: loop header
LB: loop body
LE: loop exit
PB: predicated region body
PF: predicated region fallthrough
CT: control target
= control target key end

     0   :  { %9 = vsyncpa [#allocation3], 0  ;;  %s373_s0 = inlined_call_operand.hbm [shape: f32[8,128], index: 0, kind: input, shape index: {}]   ;;  %s374_s1 = inlined_call_operand.hbm [shape: f32[8,128], index: 1, kind: input, shape index: {}]   ;;  %s375_s2 = inlined_call_operand.hbm [shape: f32[128,128], index: 2, kind: input, shape index: {}]   ;;  %s376_s3 = inlined_call_operand.hbm [shape: f32[128,128], index: 3, kind: input, shape index: {}]   ;;  %s377_s4 = inlined_call_operand.hbm [shape: f32[8,128], index: 4, kind: output, shape index: {}]  }
   0x1   :  { %10 = vsyncpa [#allocation6], 0 }
   0x2   :  { %11 = vsyncpa [#allocation9], 0  ;;  %s29_s17 = sshll.u32 %s374_s1, 4  ;;  %s30_s17 = int_to_ptr.hbm [resolvable:$true] %s29_s17 }
   0x3   :  { %12 = vsyncpa [#allocation4], 0  ;;  %s326_s18 = smov [#allocation5]   ;;  %s18_s22 = sshll.u32 %s373_s0, 4  ;;  %s19_s22 = int_to_ptr.hbm [resolvable:$true] %s18_s22 }
   0x4   :  { %s31_s19 = sshll.u32 %s326_s18, 4  ;;  %s327_s23 = smov [#allocation2]   ;;  %s32_s19 = int_to_ptr.vmem [resolvable:$true] %s31_s19 }
   0x5   :  { %34 = dma.hbm_to_vmem [thread:$0]  %s30_s17, 128, %s32_s19, [#allocation6]  }
   0x6   :  { %s20_s24 = sshll.u32 %s327_s23, 4  ;;  %s39_s27 = sshll.u32 %s375_s2, 4  ;;  %s21_s24 = int_to_ptr.vmem [resolvable:$true] %s20_s24  ;;  %s40_s27 = int_to_ptr.hbm [resolvable:$true] %s39_s27 }
   0x7   :  { %23 = dma.hbm_to_vmem [thread:$0]  %s19_s22, 128, %s21_s24, [#allocation3]  }
   0x8   :  { %s328_s1 = smov [#allocation7]   ;;  %s52_s5 = sshll.u32 %s376_s3, 4  ;;  %s53_s5 = int_to_ptr.hbm [resolvable:$true] %s52_s5 }
   0x9   :  { %s41_s28 = sshll.u32 %s328_s1, 4  ;;  %s329_s6 = smov 128   ;;  %s42_s28 = int_to_ptr.vmem [resolvable:$true] %s41_s28 }
   0xa   :  { %s330_s0 = smov 8   ;;  %s331_s7 = smov [#allocation8]  }
   0xb   :  { %47 = dma.hbm_to_vmem [thread:$0]  %s40_s27, 2048, %s42_s28, [#allocation6], %s329_s6, %s329_s6, %s330_s0  }
   0xc   :  { %s54_s8 = sshll.u32 %s331_s7, 4  ;;  %s55_s8 = int_to_ptr.vmem [resolvable:$true] %s54_s8 }
   0xd   :  { %60 = dma.hbm_to_vmem [thread:$0]  %s53_s5, 2048, %s55_s8, [#allocation9], %s329_s6, %s329_s6, %s330_s0  }
   0xe   :  { %318 = dma.done.wait [#allocation3], 128  }
   0xf   :  { %319 = vsyncadd [#allocation3], 4294967168 }
  0x10   :  { %320 = dma.done.wait [#allocation6], 2176  }
  0x11   :  { %321 = vsyncadd [#allocation6], 4294965120 }
  0x12   :  { %322 = dma.done.wait [#allocation9], 2048  }
  0x13   :  { %323 = vsyncadd [#allocation9], 4294965248  ;;  %v130_v0 = vld [vmem:[#allocation7 + $0x78] sm:$0xff]  ;;  %v129_v1 = vld [vmem:[#allocation7 + $0x70] sm:$0xff]  ;;  %s332_s2 = smov [#allocation10]   ;;  %s177_s11 = sshll.u32 %s377_s4, 4  ;;  %s178_s11 = int_to_ptr.hbm [resolvable:$true] %s177_s11 }
  0x14   :  { %132 = vmatpush.msra.mxu1 %v130_v0  ;;  %v128_v2 = vld [vmem:[#allocation7 + $0x68] sm:$0xff]  ;;  %v94_v3 = vld [vmem:[#allocation8 + $0x78] sm:$0xff]  ;;  %v127_v4 = vld [vmem:[#allocation7 + $0x60] sm:$0xff]  ;;  %s175_s3 = sshll.u32 %s332_s2, 4  ;;  %s176_s3 = int_to_ptr.vmem [resolvable:$true] %s175_s3 }
  0x15   :  { %95 = vmatpush.msra.mxu0 %v94_v3  ;;  %v93_v5 = vld [vmem:[#allocation8 + $0x70] sm:$0xff]  ;;  %v92_v6 = vld [vmem:[#allocation8 + $0x68] sm:$0xff]  ;;  %v126_v7 = vld [vmem:[#allocation7 + $0x58] sm:$0xff] }
  0x16   :  { %133 = vmatpush.msra.mxu1 %v129_v1  ;;  %v91_v8 = vld [vmem:[#allocation8 + $0x60] sm:$0xff]  ;;  %v125_v9 = vld [vmem:[#allocation7 + $0x50] sm:$0xff]  ;;  %v90_v10 = vld [vmem:[#allocation8 + $0x58] sm:$0xff] }
  0x17   :  { %96 = vmatpush.msra.mxu0 %v93_v5  ;;  %v124_v11 = vld [vmem:[#allocation7 + $0x48] sm:$0xff]  ;;  %v89_v12 = vld [vmem:[#allocation8 + $0x50] sm:$0xff]  ;;  %v123_v13 = vld [vmem:[#allocation7 + $0x40] sm:$0xff] }
  0x18   :  { %134 = vmatpush.msra.mxu1 %v128_v2  ;;  %v88_v14 = vld [vmem:[#allocation8 + $0x48] sm:$0xff]  ;;  %v122_v15 = vld [vmem:[#allocation7 + $0x38] sm:$0xff]  ;;  %v87_v16 = vld [vmem:[#allocation8 + $0x40] sm:$0xff] }
  0x19   :  { %97 = vmatpush.msra.mxu0 %v92_v6  ;;  %v121_v17 = vld [vmem:[#allocation7 + $0x30] sm:$0xff]  ;;  %v86_v18 = vld [vmem:[#allocation8 + $0x38] sm:$0xff]  ;;  %v120_v19 = vld [vmem:[#allocation7 + $0x28] sm:$0xff] }
  0x1a   :  { %135 = vmatpush.msra.mxu1 %v127_v4  ;;  %v85_v20 = vld [vmem:[#allocation8 + $0x30] sm:$0xff]  ;;  %v119_v21 = vld [vmem:[#allocation7 + $0x20] sm:$0xff]  ;;  %v84_v22 = vld [vmem:[#allocation8 + $0x28] sm:$0xff] }
  0x1b   :  { %98 = vmatpush.msra.mxu0 %v91_v8  ;;  %v118_v23 = vld [vmem:[#allocation7 + $0x18] sm:$0xff]  ;;  %v83_v24 = vld [vmem:[#allocation8 + $0x20] sm:$0xff]  ;;  %v117_v25 = vld [vmem:[#allocation7 + $0x10] sm:$0xff] }
  0x1c   :  { %136 = vmatpush.msra.mxu1 %v126_v7  ;;  %v82_v26 = vld [vmem:[#allocation8 + $0x18] sm:$0xff]  ;;  %v116_v27 = vld [vmem:[#allocation7 + $0x8] sm:$0xff]  ;;  %v81_v28 = vld [vmem:[#allocation8 + $0x10] sm:$0xff] }
  0x1d   :  { %99 = vmatpush.msra.mxu0 %v90_v10  ;;  %v115_v29 = vld [vmem:[#allocation7] sm:$0xff]  ;;  %v77_v30 = vld [vmem:[#allocation2] sm:$0xff]  ;;  %v80_v31 = vld [vmem:[#allocation8 + $0x8] sm:$0xff] }
  0x1e   :  { %137 = vmatpush.msra.mxu1 %v125_v9  ;;  %v79_v32 = vld [vmem:[#allocation8] sm:$0xff]  ;;  %v78_v33 = vld [vmem:[#allocation5] sm:$0xff]  ;;  %v131_v34 = vmul.f32 0.1, %v77_v30 }
  0x1f   :  { %100 = vmatpush.msra.mxu0 %v89_v12 }
  0x20   :  { %138 = vmatpush.msra.mxu1 %v124_v11 }
  0x21   :  { %101 = vmatpush.msra.mxu0 %v88_v14 }
  0x22   :  { %139 = vmatpush.msra.mxu1 %v123_v13 }
  0x23   :  { %102 = vmatpush.msra.mxu0 %v87_v16 }
  0x24   :  { %140 = vmatpush.msra.mxu1 %v122_v15 }
  0x25   :  { %103 = vmatpush.msra.mxu0 %v86_v18 }
  0x26   :  { %141 = vmatpush.msra.mxu1 %v121_v17 }
  0x27   :  { %104 = vmatpush.msra.mxu0 %v85_v20 }
  0x28   :  { %142 = vmatpush.msra.mxu1 %v120_v19 }
  0x29   :  { %105 = vmatpush.msra.mxu0 %v84_v22 }
  0x2a   :  { %143 = vmatpush.msra.mxu1 %v119_v21 }
  0x2b   :  { %106 = vmatpush.msra.mxu0 %v83_v24 }
  0x2c   :  { %144 = vmatpush.msra.mxu1 %v118_v23 }
  0x2d   :  { %107 = vmatpush.msra.mxu0 %v82_v26 }
  0x2e   :  { %145 = vmatpush.msra.mxu1 %v117_v25 }
  0x2f   :  { %108 = vmatpush.msra.mxu0 %v81_v28 }
  0x30   :  { %146 = vmatpush.msra.mxu1 %v116_v27 }
  0x31   :  { %109 = vmatpush.msra.mxu0 %v80_v31 }
  0x32   :  { %147 = vmatpush.msra.mxu1 %v115_v29 }
  0x33   :  { %148 = vmatmul.f32.vlgmr.msra.gmra.mxu1 %v77_v30  ;;  %110 = vmatpush.msra.mxu0 %v79_v32 }
  0x34   :  { %111 = vmatmul.f32.vlgmr.msra.gmra.mxu0 %v78_v33 }
  0xb0   :  { %v149_v35 = vpop.f32.mrf.mxu1 }
  0xb1   :  { %v150_v36 = vadd.f32 %v149_v35, %v131_v34  ;;  %v112_v45 = vpop.f32.mrf.mxu0 }
  0xb3   :  { %v152_v37 = vadd.f32 0.010000119, %v150_v36 }
  0xb5   :  { %196 = vrcp.f32 %v152_v37  ;;  %v164_v41 = vand.u32 2147483648, %v152_v37  ;;  %v162_v43 = vand.u32 2147483647, %v152_v37  ;;  %vm158_vm1 = vweird.f32 %v152_v37 }
  0xb7   :  { %v165_v46 = vor.u32 1.1754944e-38, %v164_v41  ;;  %vm163_vm3 = vcmp.eq.f32.partialorder %v162_v43, 8.507059e+37 }
  0xbb   :  { %v197_v38 = vpop.eup %196 }
  0xbc   :  { %v154_v39 = vmul.f32 %v197_v38, %v152_v37  ;;  %vm159_vm0 = vweird.f32 %v197_v38 }
  0xbd   :  { %vm160_vm2 = vmor %vm158_vm1, %vm159_vm0 }
  0xbe   :  { %v155_v40 = vsub.f32 1.0, %v154_v39 }
  0xc0   :  { %v156_v42 = vmul.f32 %v197_v38, %v155_v40 }
  0xc2   :  { %v157_v44 = vadd.f32 %v197_v38, %v156_v42 }
  0xc4   :  { %v161_v47 = vsel %vm160_vm2, %v197_v38, %v157_v44 }
  0xc5   :  { %v166_v48 = vsel %vm163_vm3, %v165_v46, %v161_v47 }
  0xc6   :  { %v167_v49 = vmul.f32 %v166_v48, %v112_v45 }
  0xc8   :  { %v168_v50 = vmul.f32 %v167_v49, %v77_v30 }
  0xca   :  { %169 = vst [vmem:[#allocation10] sm:$0xff] %v168_v50 }
  0xcb   :  { %180 = dma.vmem_to_hbm [thread:$0]  %s176_s3, 128, %s178_s11, [#allocation4]  }
  0xcc   :  { %324 = dma.done.wait [#allocation4], 128  }
  0xcd   :  { %325 = vsyncadd [#allocation4], 4294967168 }
  0xce   :  { %185 = vsyncpa [#allocation3], 1 }
  0xcf   :  { %186 = vsyncpa [#allocation6], 1 }
  0xd0   :  { %187 = vsyncpa [#allocation9], 1 }
  0xd1   :  { %188 = vsyncpa [#allocation4], 1 }

</bundles_post_ra>
